<compile_context>
chip_gen: v5e
topology: v5e:2x2
jax: 0.10.0
libtpu: 0.0.40
codegen_flags: <defaults>
</compile_context>

<pallas_src>
import jax
import jax.numpy as jnp
from jax import lax
from jax.experimental import pallas as pl
from jax.experimental.pallas import tpu as pltpu


# ----------------------------------------------------------------------------
# Kernel
# ----------------------------------------------------------------------------
def frozen_bn_kernel(x_ref, w_ref, b_ref, rm_ref, rv_ref, o_ref):
    """x_ref/o_ref: (1, C, H*W)  (channels on sublanes, spatial on lanes).
    w/b/rm/rv: (C, 1) frozen BatchNorm buffers."""
    # Per-channel affine derived from the frozen buffers (matches PyTorch: no eps).
    scale = w_ref[...] * lax.rsqrt(rv_ref[...])          # (C, 1)
    bias = b_ref[...] - rm_ref[...] * scale              # (C, 1)
    # Broadcast over the lane-dense spatial axis: (1,C,HW) * (C,1) + (C,1).
    y = x_ref[...].astype(jnp.float32) * scale + bias
    o_ref[...] = y.astype(o_ref.dtype)


# ----------------------------------------------------------------------------
# Wrapper
# ----------------------------------------------------------------------------
def frozen_batch_norm_2d(x_nchw, weight, bias, running_mean, running_var):
    """x_nchw: (B, C, H, W). Returns (B, C, H, W), same dtype as x."""
    B, C, H, W = x_nchw.shape
    HW = H * W

    # Free view: NCHW is contiguous as (B, C, H*W) -> spatial on lanes.
    x2 = x_nchw.reshape(B, C, HW)
    col = lambda v: v.reshape(C, 1).astype(jnp.float32)
    w, b, rm, rv = col(weight), col(bias), col(running_mean), col(running_var)

    vec_spec = pl.BlockSpec((C, 1), lambda i: (0, 0))
    out = pl.pallas_call(
        frozen_bn_kernel,
        out_shape=jax.ShapeDtypeStruct((B, C, HW), x_nchw.dtype),
        grid_spec=pltpu.PrefetchScalarGridSpec(
            num_scalar_prefetch=0,
            grid=(B,),
            in_specs=[
                pl.BlockSpec((1, C, HW), lambda i: (i, 0, 0)),
                vec_spec, vec_spec, vec_spec, vec_spec,
            ],
            out_specs=pl.BlockSpec((1, C, HW), lambda i: (i, 0, 0)),
        ),
        compiler_params=pltpu.CompilerParams(
            dimension_semantics=("parallel",)),   # shards batch across v7x's 2 TCs
    )(x2, w, b, rm, rv)
    return out.reshape(B, C, H, W)


# ----------------------------------------------------------------------------
# Pure-JAX reference (mirrors the PyTorch forward exactly)
# ----------------------------------------------------------------------------
def ref_forward(x_nchw, weight, bias, running_mean, running_var):
    scale = weight * lax.rsqrt(running_var)
    shift = bias - running_mean * scale
    return x_nchw * scale.reshape(1, -1, 1, 1) + shift.reshape(1, -1, 1, 1)


# ----------------------------------------------------------------------------
# Deterministic test
# ----------------------------------------------------------------------------
if __name__ == "__main__":
    key = jax.random.PRNGKey(0)
    kx, kw, kb, km, kv = jax.random.split(key, 5)

    B, C, H, W = 2, 4, 16, 16
    x = jax.random.normal(kx, (B, C, H, W), jnp.float32)

    # Frozen buffers (default would be ones/zeros; use non-trivial values so
    # the affine is actually exercised). Variance kept strictly positive.
    weight = 1.0 + 0.1 * jax.random.normal(kw, (C,), jnp.float32)
    bias = 0.1 * jax.random.normal(kb, (C,), jnp.float32)
    running_mean = 0.1 * jax.random.normal(km, (C,), jnp.float32)
    running_var = jnp.abs(1.0 + 0.1 * jax.random.normal(kv, (C,), jnp.float32))

    out = jax.jit(frozen_batch_norm_2d)(x, weight, bias, running_mean, running_var)
    jax.block_until_ready(out)

    ref = ref_forward(x, weight, bias, running_mean, running_var)
    assert out.shape == (B, C, H, W), out.shape
    assert jnp.allclose(out, ref, rtol=1e-4, atol=1e-4), \
        float(jnp.max(jnp.abs(out - ref)))

    print("KERNEL_OK")
</pallas_src>

<mosaic_0001>
module attributes {stable_mosaic.version = 11 : i64} {
  func.func @frozen_bn_kernel(%arg0: i32, %arg1: memref<1x4x256xf32, #tpu.memory_space<vmem>>, %arg2: memref<4x1xf32, #tpu.memory_space<vmem>>, %arg3: memref<4x1xf32, #tpu.memory_space<vmem>>, %arg4: memref<4x1xf32, #tpu.memory_space<vmem>>, %arg5: memref<4x1xf32, #tpu.memory_space<vmem>>, %arg6: memref<1x4x256xf32, #tpu.memory_space<vmem>>) attributes {dimension_semantics = [#tpu.dimension_semantics<parallel>], iteration_bounds = array<i64: 2>, scalar_prefetch = 0 : i64, scratch_operands = 0 : i64, tpu.core_type = #tpu.core_type<tc>, window_params = [{transform_indices = @transform_0, window_bounds = array<i64: 1, 4, 256>}, {pipeline_mode = #tpu.pipeline_mode<synchronous>, transform_indices = @transform_1, window_bounds = array<i64: 4, 1>}, {pipeline_mode = #tpu.pipeline_mode<synchronous>, transform_indices = @transform_2, window_bounds = array<i64: 4, 1>}, {pipeline_mode = #tpu.pipeline_mode<synchronous>, transform_indices = @transform_3, window_bounds = array<i64: 4, 1>}, {pipeline_mode = #tpu.pipeline_mode<synchronous>, transform_indices = @transform_4, window_bounds = array<i64: 4, 1>}, {transform_indices = @transform_5, window_bounds = array<i64: 1, 4, 256>}]} {
    %c0 = arith.constant 0 : index
    %c0_0 = arith.constant 0 : index
    %0 = vector.load %arg2[%c0, %c0_0] : memref<4x1xf32, #tpu.memory_space<vmem>>, vector<4x1xf32>
    %c0_1 = arith.constant 0 : index
    %c0_2 = arith.constant 0 : index
    %1 = vector.load %arg5[%c0_1, %c0_2] : memref<4x1xf32, #tpu.memory_space<vmem>>, vector<4x1xf32>
    %2 = math.rsqrt %1 : vector<4x1xf32>
    %3 = arith.mulf %0, %2 : vector<4x1xf32>
    %c0_3 = arith.constant 0 : index
    %c0_4 = arith.constant 0 : index
    %4 = vector.load %arg3[%c0_3, %c0_4] : memref<4x1xf32, #tpu.memory_space<vmem>>, vector<4x1xf32>
    %c0_5 = arith.constant 0 : index
    %c0_6 = arith.constant 0 : index
    %5 = vector.load %arg4[%c0_5, %c0_6] : memref<4x1xf32, #tpu.memory_space<vmem>>, vector<4x1xf32>
    %6 = arith.mulf %5, %3 : vector<4x1xf32>
    %7 = arith.subf %4, %6 : vector<4x1xf32>
    %c0_7 = arith.constant 0 : index
    %c0_8 = arith.constant 0 : index
    %c0_9 = arith.constant 0 : index
    %8 = vector.load %arg1[%c0_7, %c0_8, %c0_9] : memref<1x4x256xf32, #tpu.memory_space<vmem>>, vector<1x4x256xf32>
    %9 = vector.shape_cast %3 : vector<4x1xf32> to vector<1x4x1xf32>
    %10 = vector.broadcast %9 : vector<1x4x1xf32> to vector<1x4x256xf32>
    %11 = arith.mulf %8, %10 : vector<1x4x256xf32>
    %12 = vector.shape_cast %7 : vector<4x1xf32> to vector<1x4x1xf32>
    %13 = vector.broadcast %12 : vector<1x4x1xf32> to vector<1x4x256xf32>
    %14 = arith.addf %11, %13 : vector<1x4x256xf32>
    %c0_10 = arith.constant 0 : index
    %c0_11 = arith.constant 0 : index
    %c0_12 = arith.constant 0 : index
    %15 = vector.load %arg6[%c0_10, %c0_11, %c0_12] : memref<1x4x256xf32, #tpu.memory_space<vmem>>, vector<1x4x256xf32>
    tpu.vector_store %arg6[%c0_10, %c0_11, %c0_12], %14 {strides = array<i32>} : memref<1x4x256xf32, #tpu.memory_space<vmem>>, vector<1x4x256xf32>,
    return
  }
  func.func @transform_0(%arg0: i32) -> (i32, i32, i32) {
    %c0_i32 = arith.constant 0 : i32
    %c0_i32_0 = arith.constant 0 : i32
    %c0_i32_1 = arith.constant 0 : i32
    return %arg0, %c0_i32, %c0_i32_0 : i32, i32, i32
  }
  func.func @transform_1(%arg0: i32) -> (i32, i32) {
    %c0_i32 = arith.constant 0 : i32
    %c0_i32_0 = arith.constant 0 : i32
    %c0_i32_1 = arith.constant 0 : i32
    return %c0_i32, %c0_i32_0 : i32, i32
  }
  func.func @transform_2(%arg0: i32) -> (i32, i32) {
    %c0_i32 = arith.constant 0 : i32
    %c0_i32_0 = arith.constant 0 : i32
    %c0_i32_1 = arith.constant 0 : i32
    return %c0_i32, %c0_i32_0 : i32, i32
  }
  func.func @transform_3(%arg0: i32) -> (i32, i32) {
    %c0_i32 = arith.constant 0 : i32
    %c0_i32_0 = arith.constant 0 : i32
    %c0_i32_1 = arith.constant 0 : i32
    return %c0_i32, %c0_i32_0 : i32, i32
  }
  func.func @transform_4(%arg0: i32) -> (i32, i32) {
    %c0_i32 = arith.constant 0 : i32
    %c0_i32_0 = arith.constant 0 : i32
    %c0_i32_1 = arith.constant 0 : i32
    return %c0_i32, %c0_i32_0 : i32, i32
  }
  func.func @transform_5(%arg0: i32) -> (i32, i32, i32) {
    %c0_i32 = arith.constant 0 : i32
    %c0_i32_0 = arith.constant 0 : i32
    %c0_i32_1 = arith.constant 0 : i32
    return %arg0, %c0_i32, %c0_i32_0 : i32, i32, i32
  }
}

</mosaic_0001>

<bundles_post_ra>
// kernel: frozen_batch_norm_2d.1
= control target key start
LH: loop header
LB: loop body
LE: loop exit
PB: predicated region body
PF: predicated region fallthrough
CT: control target
= control target key end

     0   :  { %s385_s18 = smov 0   ;;  %s414_s0 = inlined_call_operand.vmem [shape: f32[2,4,256], index: 0, kind: input, shape index: {}]   ;;  %s415_s1 = inlined_call_operand.vmem [shape: f32[4,1], index: 1, kind: input, shape index: {}]   ;;  %s416_s2 = inlined_call_operand.vmem [shape: f32[4,1], index: 2, kind: input, shape index: {}]   ;;  %s417_s3 = inlined_call_operand.vmem [shape: f32[4,1], index: 3, kind: input, shape index: {}]   ;;  %s418_s4 = inlined_call_operand.vmem [shape: f32[4,1], index: 4, kind: input, shape index: {}]   ;;  %s419_s5 = inlined_call_operand.vmem [shape: f32[2,4,256], index: 5, kind: output, shape index: {}]  }
   0x1 LB: > { %s319_s19 = sadd.s32 4294967295, %s351_s18   ;;  %p323_p0 = scmp.ge.s32.totalorder %s351_s18, 1  ;;  %s351_s18 = sphi %s385_s18, %s15_s18  }
   0x2   : > { %p187_p1 = scmp.lt.s32.totalorder %s351_s18, 3 }
   0x4   : > { %p188_p2 = pnand %p323_p0, %p187_p1 }
   0x5   : > { %p215_p3 = scmp.lt.s32.totalorder (!%p188_p2), %s319_s19, 1 }
   0x6   : > { %191 = sbr.rel (%p188_p2) target bundleno = 160 (0xa0), region = 40 }
   0xb   : > { %v226_v0 = vld [vmem:[%s418_s4] sm:$0xf]  ;;  %v353_v1 = vmov 0   ;;  %s421_s19 = smov (!%p215_p3, %s319_s19), 1  ;;  %v354_v15 = vmov 839922192  }
   0xc   : > { %342 = vset.pattern.permute.xlu0 %v353_v1  ;;  %343 = vrsqrt.f32 %v226_v0  ;;  %vm233_vm0 = vweird.f32 %v226_v0  ;;  %v225_v7 = vld [vmem:[%s415_s1] sm:$0xf]  ;;  %v248_v16 = vunpack.c.l.s4 %v354_v15  ;;  %s330_s28 = sshll.u32 %s421_s19, 3 }
   0xd   : > { %v239_v10 = vld [vmem:[%s417_s3] sm:$0xf]  ;;  %s219_s6 = scalar_lea.vmem %s414_s0, %s330_s28  ;;  %s224_s9 = scalar_lea.vmem %s419_s5, %s330_s28 }
   0xe   : > { %v238_v13 = vld [vmem:[%s416_s2] sm:$0xf]  ;;  %v249_v18 = vunpack.c.0.s8 %v248_v16 }
   0xf   : > { %v242_v20 = vld [vmem:[%s219_s6] sm:$0xff] }
  0x12   : > { %v344_v2 = vpop.eup %343 }
  0x13   : > { %v228_v3 = vmul.f32 %v344_v2, %v226_v0  ;;  %vm234_vm1 = vweird.f32 %v344_v2 }
  0x14   : > { %vm235_vm2 = vmor %vm233_vm0, %vm234_vm1 }
  0x15   : > { %v229_v4 = vmul.f32 %v344_v2, %v228_v3 }
  0x17   : > { %v230_v5 = vmul.f32 0.5, %v229_v4 }
  0x19   : > { %v231_v6 = vsub.f32 1.5, %v230_v5 }
  0x1b   : > { %v232_v8 = vmul.f32 %v344_v2, %v231_v6 }
  0x1d   : > { %v236_v9 = vsel %vm235_vm2, %v344_v2, %v232_v8 }
  0x1e   : > { %v237_v11 = vmul.f32 %v236_v9, %v225_v7 }
  0x20   : > { %245 = vperm.xlu0 %342, %v237_v11   ;;  %v240_v12 = vmul.f32 %v239_v10, %v237_v11 }
  0x22   : > { %v241_v14 = vsub.f32 %v238_v13, %v240_v12 }
  0x28   : > { %255 = vperm.xlu0 %342, %v241_v14  }
  0x92   : > { %v246_v17 = vpop.permute.xlu0 %245 }
  0x93   : > { %v250_v19 = vperm.slane %v246_v17, %v249_v18 }
  0x95   : > { %v252_v22 = vmul.f32 %v250_v19, %v242_v20 }
  0x9a   : > { %v256_v21 = vpop.permute.xlu0 %255 }
  0x9b   : > { %v260_v23 = vperm.slane %v256_v21, %v249_v18 }
  0x9d   : > { %v262_v24 = vadd.f32 %v260_v23, %v252_v22 }
  0x9f   : > { %263 = vst [vmem:[%s224_s9] sm:$0xff] %v262_v24 }
  0xa0 PF: > { %s15_s18 = sadd.s32 1, %s351_s18  }
  0xa1   : > { %p12_p4 = scmp.ge.s32.totalorder %s15_s18, 4  }
  0xa3   :  { %14 = sbr.rel (!%p12_p4) target bundleno = 1 (0x1), region = 70 }

</bundles_post_ra>
